<compile_context>
chip_gen: v7x
topology: tpu7x:2x2x1
jax: 0.10.0
libtpu: 0.0.40
codegen_flags: <defaults>
</compile_context>

<pallas_src>
import functools

import jax
import jax.numpy as jnp
from jax import lax
from jax.experimental import pallas as pl
from jax.experimental.pallas import tpu as pltpu

_BIG = 1e30          # sentinel squared distance for padded points
_UNROLL_CHUNKS = 8   # fully unroll the inner M-chunk loop up to this count


def _round_up(x, m):
    return ((x + m - 1) // m) * m


def _tree_min(parts):
    """Log-depth pairwise elementwise minimum of a list of arrays (VPU-only)."""
    parts = list(parts)
    while len(parts) > 1:
        nxt = [jnp.minimum(parts[i], parts[i + 1])
               for i in range(0, len(parts) - 1, 2)]
        if len(parts) % 2:
            nxt.append(parts[-1])
        parts = nxt
    return parts[0]


def _chamfer_kernel(t_ref, s_ref, o_ref, col_min, row_sum,
                    *, tn, mc, n_chunks, n_valid, m_valid):
    """One (batch, template-block) grid step.

    t_ref:   (8, TN)     augmented template block (lane-dense)
    s_ref:   (8, M_pad)  whole augmented source cloud (resident per batch)
    o_ref:   (8, 128)    per-batch loss broadcast into a lane-dense tile
    col_min: (8, M_pad)  VMEM scratch: sublane-partial source->template minima,
                         carried across the template-block (n) grid axis
    row_sum: (1,) SMEM   running sum of sqrt(template->source minima)
    """
    n = pl.program_id(1)
    num_n = pl.num_programs(1)

    @pl.when(n == 0)
    def _init():
        row_sum[0] = jnp.float32(0.0)
        col_min[...] = jnp.full(col_min.shape, _BIG, dtype=jnp.float32)

    t = t_ref[...]                                   # (8, TN)

    def chunk_body(c, row_part):
        off = c * mc
        if not isinstance(off, int):
            off = pl.multiple_of(off, mc)
        s_chunk = s_ref[:, pl.ds(off, mc)]           # (8, MC)
        # d2[i, j] = ||t_i||^2 + ||s_j||^2 - 2 t_i.s_j in one MXU contraction.
        d2 = lax.dot_general(
            t, s_chunk, (((0,), (0,)), ((), ())),
            preferred_element_type=jnp.float32,
            precision=lax.Precision.HIGHEST)         # (TN, MC), true-f32 passes
        # Template->source: fold 128-lane groups with dense VPU mins (no XLU).
        rp = _tree_min([d2[:, j * 128:(j + 1) * 128] for j in range(mc // 128)])
        row_part = jnp.minimum(row_part, rp)         # (TN, 128)
        # Source->template: fold 8-row sublane slabs with dense VPU mins.
        cp = _tree_min([d2[r * 8:(r + 1) * 8, :] for r in range(tn // 8)])
        col_min[:, pl.ds(off, mc)] = jnp.minimum(col_min[:, pl.ds(off, mc)], cp)
        return row_part

    row_init = jnp.full((tn, 128), _BIG, dtype=jnp.float32)
    if n_chunks <= _UNROLL_CHUNKS:
        row_part = row_init
        for c in range(n_chunks):                    # unrolled at trace time
            row_part = chunk_body(c, row_part)
    else:
        row_part = lax.fori_loop(0, n_chunks, chunk_body, row_init)

    # Finalize template->source for this block: one cross-lane reduce, clamp
    # tiny negatives from the norm expansion, mask padded rows, accumulate.
    row_min = jnp.maximum(jnp.min(row_part, axis=1, keepdims=True), 0.0)  # (TN,1)
    row_ids = n * tn + lax.broadcasted_iota(jnp.int32, (tn, 1), 0)
    row_contrib = jnp.where(row_ids < n_valid, jnp.sqrt(row_min), 0.0)
    row_sum[0] = row_sum[0] + jnp.sum(row_contrib)

    @pl.when(n == num_n - 1)
    def _finalize():
        col_best = jnp.min(col_min[...], axis=0, keepdims=True)   # (1, M_pad)
        col_best = jnp.maximum(col_best, 0.0)
        col_ids = lax.broadcasted_iota(jnp.int32, col_best.shape, 1)
        col_contrib = jnp.where(col_ids < m_valid, jnp.sqrt(col_best), 0.0)
        c1 = jnp.sum(col_contrib) * (1.0 / m_valid)
        c0 = row_sum[0] * (1.0 / n_valid)
        loss = (c0 + c1) * 0.5
        o_ref[...] = jnp.full(o_ref.shape, loss, dtype=o_ref.dtype)


def _augmented(points, k_pad, *, is_lhs):
    """(B, K, 3) scaled points -> (B, 8, k_pad) lane-dense augmented features.

    Padded points get _BIG in their squared-norm slot so every distance that
    involves them is huge (never wins a minimum); they are additionally masked
    out of the final sums inside the kernel.
    """
    b, k, _ = points.shape
    sq = jnp.sum(points * points, axis=-1, keepdims=True)     # (B, K, 1)
    ones = jnp.ones_like(sq)
    zeros3 = jnp.zeros((b, k, 3), points.dtype)
    if is_lhs:
        feat = jnp.concatenate([-2.0 * points, sq, ones, zeros3], axis=-1)
        big_slot = 3
    else:
        feat = jnp.concatenate([points, ones, sq, zeros3], axis=-1)
        big_slot = 4
    if k_pad > k:
        pad = jnp.zeros((b, k_pad - k, 8), points.dtype)
        pad = pad.at[:, :, big_slot].set(_BIG)
        feat = jnp.concatenate([feat, pad], axis=1)
    return jnp.transpose(feat, (0, 2, 1))                      # (B, 8, k_pad)


def chamfer_distance_loss(template, source, *, scale=1.0, reduction="mean",
                          tn_target=512, mc_target=512):
    """JAX/Pallas equivalent of ChamferDistanceLoss.forward.

    template: (B, N, 3), source: (B, M, 3).
    """
    assert reduction in ("sum", "mean", "none")
    p0 = template.astype(jnp.float32) / scale
    p1 = source.astype(jnp.float32) / scale

    B, N, C = p0.shape
    Bs, M, Cs = p1.shape
    assert C == 3 and Cs == 3 and Bs == B

    # Tile geometry: template blocks of TN rows (multiple of 128), source
    # streamed in MC-lane chunks from a per-batch resident block of M_pad.
    tn_target = max(128, (tn_target // 128) * 128)
    mc_target = max(128, (mc_target // 128) * 128)
    n_pad = _round_up(N, 128)
    tn = min(tn_target, n_pad)
    n_pad = _round_up(n_pad, tn)
    nt = n_pad // tn
    m_pad = _round_up(M, 128)
    mc = min(mc_target, m_pad)
    m_pad = _round_up(m_pad, mc)
    n_chunks = m_pad // mc

    t_aug = _augmented(p0, n_pad, is_lhs=True)       # (B, 8, n_pad)
    s_aug = _augmented(p1, m_pad, is_lhs=False)      # (B, 8, m_pad)

    kernel = functools.partial(_chamfer_kernel, tn=tn, mc=mc,
                               n_chunks=n_chunks, n_valid=N, m_valid=M)

    # Explicit VMEM budget (v7x has only 64 MiB physical, 32 MiB scoped default).
    vmem_bytes = 4 * (2 * 8 * m_pad       # source block, double buffered
                      + 8 * m_pad         # col_min scratch (dense, 8 sublanes)
                      + 2 * 8 * tn        # template block, double buffered
                      + 2 * 8 * 128       # output tile
                      + 3 * tn * mc       # streamed d2 chunk + slack
                      + tn * 128)         # row lane-partial minima
    vmem_limit = min(max(32 << 20, int(1.5 * vmem_bytes) + (4 << 20)), 64 << 20)

    # TODO(synk): with B == 1 only one TensorCore is used on v7x; add a
    # core-split of the template-block axis (per-core col partials merged in a
    # tiny epilogue) to use both cores for single-cloud registration.
    out = pl.pallas_call(
        kernel,
        out_shape=jax.ShapeDtypeStruct((B, 8, 128), jnp.float32),
        grid=(B, nt),
        in_specs=[
            pl.BlockSpec((None, 8, tn), lambda b, n: (b, 0, n)),
            pl.BlockSpec((None, 8, m_pad), lambda b, n: (b, 0, 0)),  # resident
        ],
        out_specs=pl.BlockSpec((None, 8, 128), lambda b, n: (b, 0, 0)),
        scratch_shapes=[
            pltpu.VMEM((8, m_pad), jnp.float32),   # col sublane-partial minima
            pltpu.SMEM((1,), jnp.float32),         # running row sqrt-sum
        ],
        compiler_params=pltpu.CompilerParams(
            dimension_semantics=("parallel", "arbitrary"),
            vmem_limit_bytes=vmem_limit),
        cost_estimate=pl.CostEstimate(
            flops=2 * B * n_pad * m_pad * 8,
            transcendentals=B * (n_pad + m_pad),
            bytes_accessed=4 * B * 8 * (n_pad + m_pad + 128)),
    )(t_aug, s_aug)

    per_batch = out[:, 0, 0]                         # (B,) chamfer loss
    if reduction == "none":
        return per_batch
    elif reduction == "mean":
        return jnp.mean(per_batch, axis=0)
    else:  # sum
        return jnp.sum(per_batch, axis=0)


def _chamfer_reference(template, source, *, scale=1.0, reduction="mean"):
    """Pure-JAX reference mirroring the PyTorch module semantics."""
    p0 = template.astype(jnp.float32) / scale
    p1 = source.astype(jnp.float32) / scale
    d2 = jnp.sum((p0[:, :, None, :] - p1[:, None, :, :]) ** 2, axis=-1)
    cost_p0_p1 = jnp.min(d2, axis=2)   # (B, N)
    cost_p1_p0 = jnp.min(d2, axis=1)   # (B, M)
    c0 = jnp.mean(jnp.sqrt(cost_p0_p1), axis=-1)
    c1 = jnp.mean(jnp.sqrt(cost_p1_p0), axis=-1)
    loss = (c0 + c1) / 2.0
    if reduction == "none":
        return loss
    elif reduction == "mean":
        return jnp.mean(loss, axis=0)
    else:
        return jnp.sum(loss, axis=0)


if __name__ == "__main__":
    key = jax.random.PRNGKey(0)
    k0, k1, k2, k3, k4, k5 = jax.random.split(key, 6)

    # 1) small case: heavy padding / masking (16 -> 128 on both sides).
    B, N, M = 2, 16, 16
    template = jax.random.normal(k0, (B, N, 3), dtype=jnp.float32)
    source = jax.random.normal(k1, (B, M, 3), dtype=jnp.float32)
    out = jax.block_until_ready(
        chamfer_distance_loss(template, source, scale=1.0, reduction="mean"))
    ref = _chamfer_reference(template, source, scale=1.0, reduction="mean")
    assert jnp.allclose(out, ref, atol=1e-4, rtol=1e-4), (out, ref)

    # 2) multi-block case: grid (2, 2), 3 unrolled source chunks, exercises the
    #    carried col partials and the SMEM row-sum accumulator.
    B2, N2, M2 = 2, 256, 384
    t2 = jax.random.normal(k2, (B2, N2, 3), dtype=jnp.float32)
    s2 = jax.random.normal(k3, (B2, M2, 3), dtype=jnp.float32)
    out2 = jax.block_until_ready(
        chamfer_distance_loss(t2, s2, scale=2.0, reduction="none",
                              tn_target=128, mc_target=128))
    ref2 = _chamfer_reference(t2, s2, scale=2.0, reduction="none")
    assert jnp.allclose(out2, ref2, atol=1e-4, rtol=1e-4), (out2, ref2)

    # 3) non-multiple-of-128 sizes + fori_loop streaming path (10 chunks > 8).
    B3, N3, M3 = 1, 200, 1200
    t3 = jax.random.normal(k4, (B3, N3, 3), dtype=jnp.float32)
    s3 = jax.random.normal(k5, (B3, M3, 3), dtype=jnp.float32)
    out3 = jax.block_until_ready(
        chamfer_distance_loss(t3, s3, scale=0.5, reduction="sum",
                              tn_target=128, mc_target=128))
    ref3 = _chamfer_reference(t3, s3, scale=0.5, reduction="sum")
    assert jnp.allclose(out3, ref3, atol=1e-4, rtol=1e-4), (out3, ref3)

    print("KERNEL_OK")
</pallas_src>

<mosaic_0001>
module attributes {stable_mosaic.version = 11 : i64} {
  func.func @_chamfer_kernel(%arg0: i32, %arg1: i32, %arg2: memref<1x8x128xf32, #tpu.memory_space<vmem>>, %arg3: memref<1x8x128xf32, #tpu.memory_space<vmem>>, %arg4: memref<1x8x128xf32, #tpu.memory_space<vmem>>, %arg5: memref<8x128xf32, #tpu.memory_space<vmem>>, %arg6: memref<1xf32, #tpu.memory_space<smem>>) attributes {dimension_semantics = [#tpu.dimension_semantics<parallel>, #tpu.dimension_semantics<arbitrary>], iteration_bounds = array<i64: 2, 1>, scalar_prefetch = 0 : i64, scratch_operands = 2 : i64, tpu.core_type = #tpu.core_type<tc>, window_params = [{transform_indices = @transform_0, window_bounds = array<i64: 1, 8, 128>}, {transform_indices = @transform_1, window_bounds = array<i64: 1, 8, 128>}, {transform_indices = @transform_2, window_bounds = array<i64: 1, 8, 128>}]} {
    %c0_i32 = arith.constant 0 : i32
    %0 = arith.cmpi eq, %arg1, %c0_i32 : i32
    %1 = arith.extui %0 : i1 to i32
    %c0_i32_0 = arith.constant 0 : i32
    %2 = arith.cmpi ne, %1, %c0_i32_0 : i32
    scf.if %2 {
      %cst_19 = arith.constant 0.000000e+00 : f32
      %c0_20 = arith.constant 0 : index
      %67 = memref.load %arg6[%c0_20] : memref<1xf32, #tpu.memory_space<smem>>
      memref.store %cst_19, %arg6[%c0_20] : memref<1xf32, #tpu.memory_space<smem>>
      %cst_21 = arith.constant 1.000000e+30 : f32
      %68 = vector.broadcast %cst_21 : f32 to vector<8x128xf32>
      %c0_22 = arith.constant 0 : index
      %c0_23 = arith.constant 0 : index
      %69 = vector.load %arg5[%c0_22, %c0_23] : memref<8x128xf32, #tpu.memory_space<vmem>>, vector<8x128xf32>
      tpu.vector_store %arg5[%c0_22, %c0_23], %68 {strides = array<i32>} : memref<8x128xf32, #tpu.memory_space<vmem>>, vector<8x128xf32>,
    } else {
    }
    %c0 = arith.constant 0 : index
    %c0_1 = arith.constant 0 : index
    %c0_2 = arith.constant 0 : index
    %3 = vector.load %arg2[%c0, %c0_1, %c0_2] : memref<1x8x128xf32, #tpu.memory_space<vmem>>, vector<1x8x128xf32>
    %4 = vector.shape_cast %3 : vector<1x8x128xf32> to vector<8x128xf32>
    %cst = arith.constant 1.000000e+30 : f32
    %5 = vector.broadcast %cst : f32 to vector<128x128xf32>
    %c0_3 = arith.constant 0 : index
    %c0_4 = arith.constant 0 : index
    %c0_5 = arith.constant 0 : index
    %6 = vector.load %arg3[%c0_3, %c0_4, %c0_5] : memref<1x8x128xf32, #tpu.memory_space<vmem>>, vector<1x8x128xf32>
    %7 = vector.shape_cast %6 : vector<1x8x128xf32> to vector<8x128xf32>
    %cst_6 = arith.constant dense<0.000000e+00> : vector<128x128xf32>
    %8 = tpu.matmul %4, %7, %cst_6 {dimension_numbers = #tpu.dot_dimension_numbers<[0], [0], [1], [1], [0, 1, 1, 1], [], []>, precision = #tpu.contract_precision<fp32>} : vector<8x128xf32>, vector<8x128xf32>, vector<128x128xf32> -> vector<128x128xf32>
    %9 = arith.minimumf %5, %8 : vector<128x128xf32>
    %10 = vector.extract_strided_slice %8 {offsets = [0, 0], sizes = [8, 128], strides = [1, 1]} : vector<128x128xf32> to vector<8x128xf32>
    %11 = vector.extract_strided_slice %8 {offsets = [8, 0], sizes = [8, 128], strides = [1, 1]} : vector<128x128xf32> to vector<8x128xf32>
    %12 = vector.extract_strided_slice %8 {offsets = [16, 0], sizes = [8, 128], strides = [1, 1]} : vector<128x128xf32> to vector<8x128xf32>
    %13 = vector.extract_strided_slice %8 {offsets = [24, 0], sizes = [8, 128], strides = [1, 1]} : vector<128x128xf32> to vector<8x128xf32>
    %14 = vector.extract_strided_slice %8 {offsets = [32, 0], sizes = [8, 128], strides = [1, 1]} : vector<128x128xf32> to vector<8x128xf32>
    %15 = vector.extract_strided_slice %8 {offsets = [40, 0], sizes = [8, 128], strides = [1, 1]} : vector<128x128xf32> to vector<8x128xf32>
    %16 = vector.extract_strided_slice %8 {offsets = [48, 0], sizes = [8, 128], strides = [1, 1]} : vector<128x128xf32> to vector<8x128xf32>
    %17 = vector.extract_strided_slice %8 {offsets = [56, 0], sizes = [8, 128], strides = [1, 1]} : vector<128x128xf32> to vector<8x128xf32>
    %18 = vector.extract_strided_slice %8 {offsets = [64, 0], sizes = [8, 128], strides = [1, 1]} : vector<128x128xf32> to vector<8x128xf32>
    %19 = vector.extract_strided_slice %8 {offsets = [72, 0], sizes = [8, 128], strides = [1, 1]} : vector<128x128xf32> to vector<8x128xf32>
    %20 = vector.extract_strided_slice %8 {offsets = [80, 0], sizes = [8, 128], strides = [1, 1]} : vector<128x128xf32> to vector<8x128xf32>
    %21 = vector.extract_strided_slice %8 {offsets = [88, 0], sizes = [8, 128], strides = [1, 1]} : vector<128x128xf32> to vector<8x128xf32>
    %22 = vector.extract_strided_slice %8 {offsets = [96, 0], sizes = [8, 128], strides = [1, 1]} : vector<128x128xf32> to vector<8x128xf32>
    %23 = vector.extract_strided_slice %8 {offsets = [104, 0], sizes = [8, 128], strides = [1, 1]} : vector<128x128xf32> to vector<8x128xf32>
    %24 = vector.extract_strided_slice %8 {offsets = [112, 0], sizes = [8, 128], strides = [1, 1]} : vector<128x128xf32> to vector<8x128xf32>
    %25 = vector.extract_strided_slice %8 {offsets = [120, 0], sizes = [8, 128], strides = [1, 1]} : vector<128x128xf32> to vector<8x128xf32>
    %26 = arith.minimumf %10, %11 : vector<8x128xf32>
    %27 = arith.minimumf %12, %13 : vector<8x128xf32>
    %28 = arith.minimumf %14, %15 : vector<8x128xf32>
    %29 = arith.minimumf %16, %17 : vector<8x128xf32>
    %30 = arith.minimumf %18, %19 : vector<8x128xf32>
    %31 = arith.minimumf %20, %21 : vector<8x128xf32>
    %32 = arith.minimumf %22, %23 : vector<8x128xf32>
    %33 = arith.minimumf %24, %25 : vector<8x128xf32>
    %34 = arith.minimumf %26, %27 : vector<8x128xf32>
    %35 = arith.minimumf %28, %29 : vector<8x128xf32>
    %36 = arith.minimumf %30, %31 : vector<8x128xf32>
    %37 = arith.minimumf %32, %33 : vector<8x128xf32>
    %38 = arith.minimumf %34, %35 : vector<8x128xf32>
    %39 = arith.minimumf %36, %37 : vector<8x128xf32>
    %40 = arith.minimumf %38, %39 : vector<8x128xf32>
    %c0_7 = arith.constant 0 : index
    %c0_8 = arith.constant 0 : index
    %41 = vector.load %arg5[%c0_7, %c0_8] : memref<8x128xf32, #tpu.memory_space<vmem>>, vector<8x128xf32>
    %42 = arith.minimumf %41, %40 : vector<8x128xf32>
    %c0_9 = arith.constant 0 : index
    %c0_10 = arith.constant 0 : index
    %43 = vector.load %arg5[%c0_9, %c0_10] : memref<8x128xf32, #tpu.memory_space<vmem>>, vector<8x128xf32>
    tpu.vector_store %arg5[%c0_9, %c0_10], %42 {strides = array<i32>} : memref<8x128xf32, #tpu.memory_space<vmem>>, vector<8x128xf32>,
    %cst_11 = arith.constant dense<0x7F800000> : vector<128xf32>
    %44 = vector.multi_reduction <minimumf>, %9, %cst_11 [1] : vector<128x128xf32> to vector<128xf32>
    %45 = vector.shape_cast %44 : vector<128xf32> to vector<128x1xf32>
    %cst_12 = arith.constant 0.000000e+00 : f32
    %46 = vector.broadcast %cst_12 : f32 to vector<128x1xf32>
    %47 = arith.maximumf %45, %46 : vector<128x1xf32>
    %c128_i32 = arith.constant 128 : i32
    %48 = arith.muli %arg1, %c128_i32 : i32
    %49 = tpu.iota {dimensions = array<i32: 0>} : vector<128x1xi32>
    %50 = vector.broadcast %48 : i32 to vector<128x1xi32>
    %51 = arith.addi %50, %49 : vector<128x1xi32>
    %c16_i32 = arith.constant 16 : i32
    %52 = vector.broadcast %c16_i32 : i32 to vector<128x1xi32>
    %53 = arith.cmpi slt, %51, %52 : vector<128x1xi32>
    %54 = math.sqrt %47 : vector<128x1xf32>
    %cst_13 = arith.constant 0.000000e+00 : f32
    %55 = vector.broadcast %cst_13 : f32 to vector<128x1xf32>
    %56 = arith.select %53, %54, %55 : vector<128x1xi1>, vector<128x1xf32>
    %c0_14 = arith.constant 0 : index
    %57 = memref.load %arg6[%c0_14] : memref<1xf32, #tpu.memory_space<smem>>
    %58 = vector.shape_cast %56 : vector<128x1xf32> to vector<1x128x1xf32>
    %cst_15 = arith.constant dense<0.000000e+00> : vector<1xf32>
    %59 = vector.multi_reduction <add>, %58, %cst_15 [1, 2] : vector<1x128x1xf32> to vector<1xf32>
    %60 = vector.shape_cast %59 : vector<1xf32> to vector<1x1x1xf32>
    %61 = vector.extract %60[0, 0, 0] : f32 from vector<1x1x1xf32>
    %62 = arith.addf %57, %61 : f32
    %c0_16 = arith.constant 0 : index
    %63 = memref.load %arg6[%c0_16] : memref<1xf32, #tpu.memory_space<smem>>
    memref.store %62, %arg6[%c0_16] : memref<1xf32, #tpu.memory_space<smem>>
    %c0_i32_17 = arith.constant 0 : i32
    %64 = arith.cmpi eq, %arg1, %c0_i32_17 : i32
    %65 = arith.extui %64 : i1 to i32
    %c0_i32_18 = arith.constant 0 : i32
    %66 = arith.cmpi ne, %65, %c0_i32_18 : i32
    scf.if %66 {
      %c0_19 = arith.constant 0 : index
      %c0_20 = arith.constant 0 : index
      %67 = vector.load %arg5[%c0_19, %c0_20] : memref<8x128xf32, #tpu.memory_space<vmem>>, vector<8x128xf32>
      %cst_21 = arith.constant dense<0x7F800000> : vector<128xf32>
      %68 = vector.multi_reduction <minimumf>, %67, %cst_21 [0] : vector<8x128xf32> to vector<128xf32>
      %69 = vector.shape_cast %68 : vector<128xf32> to vector<1x128xf32>
      %cst_22 = arith.constant 0.000000e+00 : f32
      %70 = vector.broadcast %cst_22 : f32 to vector<1x128xf32>
      %71 = arith.maximumf %69, %70 : vector<1x128xf32>
      %72 = tpu.iota {dimensions = array<i32: 1>} : vector<1x128xi32>
      %c16_i32_23 = arith.constant 16 : i32
      %73 = vector.broadcast %c16_i32_23 : i32 to vector<1x128xi32>
      %74 = arith.cmpi slt, %72, %73 : vector<1x128xi32>
      %75 = math.sqrt %71 : vector<1x128xf32>
      %cst_24 = arith.constant 0.000000e+00 : f32
      %76 = vector.broadcast %cst_24 : f32 to vector<1x128xf32>
      %77 = arith.select %74, %75, %76 : vector<1x128xi1>, vector<1x128xf32>
      %78 = vector.shape_cast %77 : vector<1x128xf32> to vector<1x1x128xf32>
      %cst_25 = arith.constant dense<0.000000e+00> : vector<1xf32>
      %79 = vector.multi_reduction <add>, %78, %cst_25 [1, 2] : vector<1x1x128xf32> to vector<1xf32>
      %80 = vector.shape_cast %79 : vector<1xf32> to vector<1x1x1xf32>
      %81 = vector.extract %80[0, 0, 0] : f32 from vector<1x1x1xf32>
      %cst_26 = arith.constant 6.250000e-02 : f32
      %82 = arith.mulf %81, %cst_26 : f32
      %c0_27 = arith.constant 0 : index
      %83 = memref.load %arg6[%c0_27] : memref<1xf32, #tpu.memory_space<smem>>
      %cst_28 = arith.constant 6.250000e-02 : f32
      %84 = arith.mulf %83, %cst_28 : f32
      %85 = arith.addf %84, %82 : f32
      %cst_29 = arith.constant 5.000000e-01 : f32
      %86 = arith.mulf %85, %cst_29 : f32
      %87 = vector.broadcast %86 : f32 to vector<8x128xf32>
      %c0_30 = arith.constant 0 : index
      %c0_31 = arith.constant 0 : index
      %c0_32 = arith.constant 0 : index
      %88 = vector.load %arg4[%c0_30, %c0_31, %c0_32] : memref<1x8x128xf32, #tpu.memory_space<vmem>>, vector<1x8x128xf32>
      %89 = vector.shape_cast %88 : vector<1x8x128xf32> to vector<8x128xf32>
      %90 = vector.shape_cast %87 : vector<8x128xf32> to vector<1x8x128xf32>
      tpu.vector_store %arg4[%c0_30, %c0_31, %c0_32], %90 {strides = array<i32>} : memref<1x8x128xf32, #tpu.memory_space<vmem>>, vector<1x8x128xf32>,
    } else {
    }
    return
  }
  func.func @transform_0(%arg0: i32, %arg1: i32) -> (i32, i32, i32) {
    %c0_i32 = arith.constant 0 : i32
    %c0_i32_0 = arith.constant 0 : i32
    return %arg0, %c0_i32, %arg1 : i32, i32, i32
  }
  func.func @transform_1(%arg0: i32, %arg1: i32) -> (i32, i32, i32) {
    %c0_i32 = arith.constant 0 : i32
    %c0_i32_0 = arith.constant 0 : i32
    %c0_i32_1 = arith.constant 0 : i32
    return %arg0, %c0_i32, %c0_i32_0 : i32, i32, i32
  }
  func.func @transform_2(%arg0: i32, %arg1: i32) -> (i32, i32, i32) {
    %c0_i32 = arith.constant 0 : i32
    %c0_i32_0 = arith.constant 0 : i32
    %c0_i32_1 = arith.constant 0 : i32
    return %arg0, %c0_i32, %c0_i32_0 : i32, i32, i32
  }
}

</mosaic_0001>

<bundles_post_ra>
// kernel: tpu_custom_call.1
= control target key start
LH: loop header
LB: loop body
LE: loop exit
PB: predicated region body
PF: predicated region fallthrough
CT: control target
= control target key end

     0   :  { %7 = vsyncpa [#allocation5], 0  ;;  %s2886_s0 = inlined_call_operand.hbm [shape: f32[2,8,128], index: 0, kind: input, shape index: {}]   ;;  %s2887_s1 = inlined_call_operand.hbm [shape: f32[2,8,128], index: 1, kind: input, shape index: {}]   ;;  %s2888_s2 = inlined_call_operand.hbm [shape: f32[2,8,128], index: 2, kind: output, shape index: {}]  }
   0x1   :  { %9 = vsyncpa [#allocation5 + $0x1], 0 }
   0x2   :  { %10 = vsyncpa [#allocation8], 0 }
   0x3   :  { %12 = vsyncpa [#allocation8 + $0x1], 0 }
   0x4   :  { %13 = vsyncpa [#allocation6], 0 }
   0x5   :  { %15 = vsyncpa [#allocation6 + $0x1], 0  ;;  %s2452_s9 = smov 0   ;;  %s2454_s10 = smov 0  }
   0x6   :  { %s2456_s11 = smov 0   ;;  %s2458_s12 = smov 0  }
   0x7   :  { %s2460_s13 = smov 0   ;;  %s2462_s14 = smov 0  }
   0x8 LB: > { %s1854_s15 = sadd.s32 4294967295, %s2432_s14   ;;  %s1855_s16 = sadd.s32 4294967294, %s2432_s14   ;;  %s2432_s14 = sphi %s2462_s14, %s21_s14   ;;  %s2428_s13 = sphi %s2460_s13, %s2908_s13   ;;  %s2424_s12 = sphi %s2458_s12, %s2907_s12   ;;  %s2420_s11 = sphi %s2456_s11, %s2906_s11   ;;  %s2416_s10 = sphi %s2454_s10, %s2905_s10   ;;  %s2412_s9 = sphi %s2452_s9, %s2904_s9  }
   0x9   : > { %s33_s17 = sadd.s32 1, %s2428_s13  ;;  %s42_s18 = sadd.s32 1, %s2420_s11 }
   0xa   : > { %p35_p0 = scmp.ge.s32.totalorder %s33_s17, 2  ;;  %p49_p1 = scmp.ne.s32.totalorder %s2420_s11, %s2416_s10 }
   0xb   : > { %p50_p2 = scmp.eq.s32.totalorder %s2432_s14, 0  ;;  %p55_p3 = scmp.ne.s32.totalorder %s2416_s10, %s2412_s9 }
   0xc   : > { %s2910_s17 = smov (%p35_p0, %s33_s17), 0  ;;  %p56_p5 = scmp.eq.s32.totalorder %s1854_s15, 0 }
   0xd   : > { %p2493_p4 = por %p50_p2, %p49_p1  ;;  %s37_s20 = ssub.s32 %s2428_s13, %s2910_s17 }
   0xe   : > { %p105_p6 = scmp.eq.s32.totalorder %s1854_s15, 1  ;;  %p40_p7 = scmp.eq.s32.totalorder %s37_s20, 0 }
   0xf   : > { %p2499_p8 = por %p56_p5, %p55_p3  ;;  %p111_p10 = scmp.eq.s32.totalorder %s1855_s16, 1 }
  0x10   : > { %p2503_p9 = por %p105_p6, %p49_p1  ;;  %p2229_p13 = scmp.lt.s32.totalorder %s2432_s14, 2 }
  0x11   : > { %s2892_s21 = scalar_select %p2499_p8, 1, 0 }
  0x12   : > { %s2893_s22 = scalar_select %p2503_p9, 1, 0 }
  0x13   : > { %s2508_s23 = scalar_select %p40_p7, %s2420_s11, %s42_s18  }
  0x14   : > { %p2510_p11 = por %p111_p10, %p55_p3  ;;  %s2517_s25 = sand.u32 1, %s2420_s11  }
  0x15   : > { %s1858_s26 = sshll.u32 %s2517_s25, 3  ;;  %s1859_s27 = sshll.u32 %s2428_s13, 7 }
  0x16   : > { %s2894_s24 = scalar_select %p2510_p11, 1, 0 }
  0x17   : > { %s2526_s30 = scalar_lea.hbm %s2886_s0, %s1859_s27  ;;  %s135_s3 = scalar_lea.vmem [#allocation4], %s1858_s26 }
  0x18   : > { %s143_s4 = sshll.u32 %s135_s3, 4  ;;  %p2534_p0 = pnand %p2229_p13, %p2493_p4  ;;  %s2530_s4 = int_to_ptr.vmem [resolvable:$true] %s143_s4 }
  0x19   : > { %s132_s6 = scalar_lea.sflag [#allocation5], %s2517_s25  ;;  %s2286_s7 = scalar_lea.hbm %s2526_s30, 128 }
  0x1a   : > { %p2287_p3 = scmp.ne.s32.totalorder %s2526_s30, %s2286_s7  ;;  %p2288_p5 = pneg %p2534_p0 }
  0x1b   : > { %s2291_s16 = scalar_lea.hbm %s2886_s0, 256  ;;  %p2292_p4 = scmp.lt.u32.totalorder %s2526_s30, %s2886_s0 }
  0x1c   : > { %p2289_p6 = pnand %p2288_p5, %p2287_p3  ;;  %p2293_p10 = scmp.lt.u32.totalorder %s2291_s16, %s2286_s7 }
  0x1d   : > { %p2295_p12 = scmp.lt.u32.totalorder %s2286_s7, %s2526_s30 }
  0x1e   : > { %p2290_p7 = pneg %p2289_p6  ;;  %p2294_p13 = por %p2293_p10, %p2292_p4 }
  0x20   : > { %p2296_p1 = por %p2295_p12, %p2294_p13 }
  0x22   : > { %p2297_p2 = pnand %p2296_p1, %p2290_p7 }
  0x24   : > { %2300 = shalt.err (!%p2297_p2)
}
  0x25   : > { %s2301_s20 = scalar_lea.vmem %s2530_s4, 128  ;;  %s2434_s28 = smov [#allocation4]  }
  0x26   : > { %p2302_p3 = scmp.ne.s32.totalorder %s2530_s4, %s2301_s20  ;;  %s2306_s29 = sshll.u32 %s2434_s28, 4  ;;  %s2307_s29 = int_to_ptr.vmem [resolvable:$false] %s2306_s29 }
  0x27   : > { %s2308_s3 = scalar_lea.vmem %s2307_s29, 256  ;;  %p2309_p9 = scmp.lt.s32.totalorder %s2530_s4, %s2307_s29 }
  0x28   : > { %p2304_p6 = pnand %p2302_p3, %p2288_p5  ;;  %p2310_p4 = scmp.lt.s32.totalorder %s2308_s3, %s2301_s20 }
  0x2a   : > { %p2305_p11 = pneg %p2304_p6  ;;  %p2311_p10 = por %p2310_p4, %p2309_p9 }
  0x2c   : > { %p2312_p12 = pnand %p2311_p10, %p2305_p11 }
  0x2e   : > { %2315 = shalt.err (!%p2312_p12)
}
  0x2f   : > { %2221 = dma.hbm_to_vmem [thread:$0]  (!%p2534_p0), %s2526_s30, 128, %s2530_s4, %s132_s6  }
  0x30   : > { %p2896_p1 = scmp.lt.s32.totalorder %s2432_s14, 3  ;;  %p2897_p2 = scmp.ge.s32.totalorder %s2432_s14, 1 }
  0x31   : > { %s2579_s16 = scalar_lea.hbm %s2887_s1, %s1859_s27  ;;  %s154_s18 = scalar_lea.vmem [#allocation7], %s1858_s26 }
  0x32   : > { %p2570_p7 = pnand %p2897_p2, %p2896_p1  ;;  %s161_s19 = sshll.u32 %s154_s18, 4  ;;  %s162_s19 = int_to_ptr.vmem [resolvable:$true] %s161_s19 }
  0x33   : > { %s151_s30 = scalar_lea.sflag [#allocation8], %s2517_s25  ;;  %s2316_s4 = scalar_lea.hbm %s2579_s16, 128 }
  0x34   : > { %s2898_s7 = scalar_select %p2570_p7, 1, 0 }
  0x35   : > { %p2317_p9 = scmp.ne.s32.totalorder %s2579_s16, %s2316_s4  ;;  %s2321_s27 = scalar_lea.hbm %s2887_s1, 256 }
  0x36   : > { %p2322_p3 = scmp.lt.u32.totalorder %s2579_s16, %s2887_s1  ;;  %p2323_p6 = scmp.lt.u32.totalorder %s2321_s27, %s2316_s4 }
  0x37   : > { %p2319_p11 = pnand %p2317_p9, %p2288_p5  ;;  %p2325_p10 = scmp.lt.u32.totalorder %s2316_s4, %s2579_s16 }
  0x38   : > { %p2324_p4 = por %p2323_p6, %p2322_p3 }
  0x39   : > { %p2320_p13 = pneg %p2319_p11 }
  0x3a   : > { %p2326_p12 = por %p2325_p10, %p2324_p4 }
  0x3c   : > { %p2327_p1 = pnand %p2326_p12, %p2320_p13 }
  0x3e   : > { %2330 = shalt.err (!%p2327_p1)
}
  0x3f   : > { %s2331_s25 = scalar_lea.vmem %s162_s19, 128  ;;  %s2435_s26 = smov [#allocation7]  }
  0x40   : > { %p2332_p2 = scmp.ne.s32.totalorder %s162_s19, %s2331_s25  ;;  %s2336_s3 = sshll.u32 %s2435_s26, 4  ;;  %s2337_s3 = int_to_ptr.vmem [resolvable:$false] %s2336_s3 }
  0x41   : > { %s2338_s8 = scalar_lea.vmem %s2337_s3, 256  ;;  %p2339_p8 = scmp.lt.s32.totalorder %s162_s19, %s2337_s3 }
  0x42   : > { %p2334_p9 = pnand %p2332_p2, %p2288_p5  ;;  %p2340_p7 = scmp.lt.s32.totalorder %s2338_s8, %s2331_s25 }
  0x44   : > { %p2335_p11 = pneg %p2334_p9  ;;  %p2341_p3 = por %p2340_p7, %p2339_p8 }
  0x46   : > { %p2342_p6 = pnand %p2341_p3, %p2335_p11 }
  0x48   : > { %2345 = shalt.err (!%p2342_p6)
}
  0x49   : > { %2224 = dma.hbm_to_vmem [thread:$0]  (!%p2534_p0), %s2579_s16, 128, %s162_s19, %s151_s30  }
  0x4a   : > { %p2899_p13 = scmp.ne.s32.totalorder %s2898_s7, 0 }
  0x4b   : > { %s2606_s15 = sand.u32 (!%p2899_p13), 1, %s2416_s10   ;;  %p2900_p8 = scmp.ne.s32.totalorder (!%p2899_p13), %s2892_s21, 0 }
  0x4c   : > { %170 = sbr.rel (%p2899_p13) target bundleno = 931 (0x3a3), region = 28  ;;  %s2609_s18 = sshll.u32 (!%p2899_p13), %s2606_s15, 3 }
  0x4d   : > { %s173_s4 = scalar_lea.sflag (!%p2899_p13), [#allocation5], %s2606_s15  ;;  %s176_s6 = scalar_lea.vmem (!%p2899_p13), [#allocation4], %s2609_s18 }
  0x53   : > { %2399 = dma.done.wait (%p2900_p8), %s173_s4, 128  }
  0x54   : > { %2401 = vsyncadd (%p2900_p8), %s173_s4, 4294967168  ;;  %s182_s5 = scalar_lea.sflag [#allocation8], %s2606_s15  ;;  %s185_s7 = scalar_lea.vmem [#allocation7], %s2609_s18 }
  0x55   : > { %2403 = dma.done.wait (%p2900_p8), %s182_s5, 128  }
  0x56   : > { %2405 = vsyncadd (%p2900_p8), %s182_s5, 4294967168  ;;  %v218_v0 = vld [vmem:[%s176_s6] sm:$0xff]  ;;  %v219_v1 = vld [vmem:[%s185_s7] sm:$0xff]  ;;  %vm252_vm0 = vcmask 64512   ;;  %vm1654_vm1 = vcmask 7168   ;;  %vm1720_vm9 = vcmask 1040384  }
  0x57   : > { %220 = vxpose.xlu0.b32.start.end [1/1] (short) %v218_v0, 128  ;;  %v2623_v2 = vand.u32 4294901760, %v219_v1  ;;  %s1867_s20 = sshll.u32 %s2424_s12, 7  ;;  %s210_s28 = scalar_lea.vmem [#allocation9], %s2609_s18 }
  0x58   : > { %s1752_s29 = sshll.u32 %s210_s28, 4  ;;  %s2837_s8 = scalar_lea.hbm %s2888_s2, %s1867_s20  ;;  %s2839_s29 = int_to_ptr.vmem [resolvable:$true] %s1752_s29 }
  0x59   : > { %2050 = vmatprep.subr.mxu0 %v2623_v2  ;;  %1972 = vmatprep.subr.mxu1 %v2623_v2  ;;  %v2630_v3 = vsub.f32 %v219_v1, %v2623_v2  ;;  %s1739_s4 = scalar_lea.sflag [#allocation6], %s2606_s15  ;;  %s2346_s6 = scalar_lea.vmem %s2839_s29, 128 }
  0x5a   : > { %2051 = vmatpush3.msra.mxu0 %v2623_v2  ;;  %1973 = vmatpush3.msra.mxu1 %v2623_v2  ;;  %p2347_p0 = scmp.ne.s32.totalorder %s2839_s29, %s2346_s6  ;;  %p2901_p5 = scmp.ne.s32.totalorder %s2893_s22, 0 }
  0x5b   : > { %v530_v4 = vand.u32 4294901760, %v2630_v3  ;;  %s2436_s12 = smov [#allocation9]  }
  0x5c   : > { %p2348_p7 = pnand %p2347_p0, %p2901_p5  ;;  %s2350_s18 = sshll.u32 %s2436_s12, 4  ;;  %s2351_s18 = int_to_ptr.vmem [resolvable:$false] %s2350_s18 }
  0x5d   : > { %v531_v5 = vsub.f32 %v2630_v3, %v530_v4  ;;  %2076 = vmatprep.subr.mxu0 %v530_v4  ;;  %s2352_s5 = scalar_lea.vmem %s2351_s18, 256  ;;  %p2353_p10 = scmp.lt.s32.totalorder %s2839_s29, %s2351_s18 }
  0x5e   : > { %p2349_p4 = pneg %p2348_p7  ;;  %p2354_p12 = scmp.lt.s32.totalorder %s2352_s5, %s2346_s6 }
  0x5f   : > { %v532_v6 = vand.u32 4294901760, %v531_v5 }
  0x60   : > { %p2355_p1 = por %p2354_p12, %p2353_p10 }
  0x61   : > { %1998 = vmatprep.subr.mxu1 %v532_v6 }
  0x62   : > { %p2356_p2 = pnand %p2355_p1, %p2349_p4 }
  0xd7   : > { %v236_v7 = vpop.trf.xlu0 }
  0xd8   : > { %v254_v8 = vsel %vm252_vm0, %v236_v7, 0 }
  0xd9   : > { %v2635_v9 = vand.u32 4294901760, %v254_v8 }
  0xdb   : > { %v2638_v10 = vsub.f32 %v254_v8, %v2635_v9  ;;  %v237_v11 = vpop.trf.xlu0 }
  0xdc   : > { %v257_v12 = vsel %vm252_vm0, %v237_v11, 0 }
  0xdd   : > { %v2641_v13 = vand.u32 4294901760, %v257_v12  ;;  %v369_v14 = vand.u32 4294901760, %v2638_v10 }
  0xdf   : > { %v2645_v15 = vsub.f32 %v257_v12, %v2641_v13  ;;  %2052 = vmatprep.mubr.f32.mxu0 %v369_v14  ;;  %v238_v16 = vpop.trf.xlu0  ;;  %v370_v17 = vsub.f32 %v2638_v10, %v369_v14 }
  0xe0   : > { %v260_v18 = vsel %vm252_vm0, %v238_v16, 0 }
  0xe1   : > { %v2649_v19 = vand.u32 4294901760, %v260_v18  ;;  %v371_v20 = vand.u32 4294901760, %v370_v17  ;;  %v379_v21 = vand.u32 4294901760, %v2645_v15 }
  0xe3   : > { %v2653_v22 = vsub.f32 %v260_v18, %v2649_v19  ;;  %1974 = vmatprep.mubr.f32.mxu1 %v371_v20  ;;  %2053 = vmatmul.mubr.f32.vlgmr.msra.gmra.mrb[0].mxu0 %v379_v21  ;;  %v239_v23 = vpop.trf.xlu0  ;;  %v380_v24 = vsub.f32 %v2645_v15, %v379_v21 }
  0xe4   : > { %v263_v25 = vsel %vm252_vm0, %v239_v23, 0  ;;  %2077 = vmatpush3.msra.mxu0 %v530_v4 }
  0xe5   : > { %v2657_v26 = vand.u32 4294901760, %v263_v25  ;;  %v381_v27 = vand.u32 4294901760, %v380_v24  ;;  %v389_v28 = vand.u32 4294901760, %v2653_v22  ;;  %2102 = vmatprep.subr.mxu0 %v2623_v2 }
  0xe7   : > { %v2662_v29 = vsub.f32 %v263_v25, %v2657_v26  ;;  %1975 = vmatmul.mubr.f32.vlgmr.msra.gmra.mrb[0].mxu1 %v381_v27  ;;  %2055 = vmatprep.mubr.f32.mxu0 %v389_v28  ;;  %v240_v30 = vpop.trf.xlu0  ;;  %v390_v31 = vsub.f32 %v2653_v22, %v389_v28 }
  0xe8   : > { %v266_v32 = vsel %vm252_vm0, %v240_v30, 0  ;;  %1999 = vmatpush3.msra.mxu1 %v532_v6 }
  0xe9   : > { %v2666_v33 = vand.u32 4294901760, %v266_v32  ;;  %v391_v34 = vand.u32 4294901760, %v390_v31  ;;  %v399_v35 = vand.u32 4294901760, %v2662_v29  ;;  %2024 = vmatprep.subr.mxu1 %v2630_v3 }
  0xeb   : > { %v2671_v36 = vsub.f32 %v266_v32, %v2666_v33  ;;  %1977 = vmatprep.mubr.f32.mxu1 %v391_v34  ;;  %2056 = vmatmul.mubr.f32.gmra.mrb[2].mxu0 %v399_v35  ;;  %v241_v37 = vpop.trf.xlu0  ;;  %v400_v38 = vsub.f32 %v2662_v29, %v399_v35 }
  0xec   : > { %v269_v39 = vsel %vm252_vm0, %v241_v37, 0 }
  0xed   : > { %v2675_v40 = vand.u32 4294901760, %v269_v39  ;;  %v401_v41 = vand.u32 4294901760, %v400_v38  ;;  %v409_v42 = vand.u32 4294901760, %v2671_v36 }
  0xef   : > { %v2679_v43 = vsub.f32 %v269_v39, %v2675_v40  ;;  %1978 = vmatmul.mubr.f32.gmra.mrb[2].mxu1 %v401_v41  ;;  %2058 = vmatprep.mubr.f32.mxu0 %v409_v42  ;;  %v242_v44 = vpop.trf.xlu0  ;;  %v410_v45 = vsub.f32 %v2671_v36, %v409_v42 }
  0xf0   : > { %v272_v46 = vsel %vm252_vm0, %v242_v44, 0 }
  0xf1   : > { %v2683_v47 = vand.u32 4294901760, %v272_v46  ;;  %v411_v48 = vand.u32 4294901760, %v410_v45  ;;  %v419_v49 = vand.u32 4294901760, %v2679_v43 }
  0xf3   : > { %v2687_v50 = vsub.f32 %v272_v46, %v2683_v47  ;;  %1980 = vmatprep.mubr.f32.mxu1 %v411_v48  ;;  %2059 = vmatmul.mubr.f32.gmra.mrb[4].mxu0 %v419_v49  ;;  %v243_v51 = vpop.trf.xlu0  ;;  %v420_v52 = vsub.f32 %v2679_v43, %v419_v49 }
  0xf4   : > { %v275_v53 = vsel %vm252_vm0, %v243_v51, 0 }
  0xf5   : > { %v2691_v54 = vand.u32 4294901760, %v275_v53  ;;  %v421_v55 = vand.u32 4294901760, %v420_v52  ;;  %v429_v56 = vand.u32 4294901760, %v2687_v50 }
  0xf7   : > { %v2695_v57 = vsub.f32 %v275_v53, %v2691_v54  ;;  %1981 = vmatmul.mubr.f32.gmra.mrb[4].mxu1 %v421_v55  ;;  %2061 = vmatprep.mubr.f32.mxu0 %v429_v56  ;;  %v244_v58 = vpop.trf.xlu0  ;;  %v430_v59 = vsub.f32 %v2687_v50, %v429_v56 }
  0xf8   : > { %v278_v60 = vsel %vm252_vm0, %v244_v58, 0 }
  0xf9   : > { %v2699_v61 = vand.u32 4294901760, %v278_v60  ;;  %v431_v62 = vand.u32 4294901760, %v430_v59  ;;  %v439_v63 = vand.u32 4294901760, %v2695_v57 }
  0xfb   : > { %v2703_v0 = vsub.f32 %v278_v60, %v2699_v61  ;;  %1983 = vmatprep.mubr.f32.mxu1 %v431_v62  ;;  %2062 = vmatmul.mubr.f32.gmra.mrb[6].mxu0 %v439_v63  ;;  %v245_v1 = vpop.trf.xlu0  ;;  %v440_v4 = vsub.f32 %v2695_v57, %v439_v63 }
  0xfc   : > { %v281_v5 = vsel %vm252_vm0, %v245_v1, 0 }
  0xfd   : > { %v2707_v6 = vand.u32 4294901760, %v281_v5  ;;  %v441_v7 = vand.u32 4294901760, %v440_v4  ;;  %v449_v8 = vand.u32 4294901760, %v2703_v0 }
  0xff   : > { %v2711_v11 = vsub.f32 %v281_v5, %v2707_v6  ;;  %1984 = vmatmul.mubr.f32.gmra.mrb[6].mxu1 %v441_v7  ;;  %2064 = vmatprep.mubr.f32.mxu0 %v449_v8  ;;  %v246_v12 = vpop.trf.xlu0  ;;  %v450_v14 = vsub.f32 %v2703_v0, %v449_v8 }
 0x100   : > { %v284_v16 = vsel %vm252_vm0, %v246_v12, 0 }
 0x101   : > { %v2715_v17 = vand.u32 4294901760, %v284_v16  ;;  %v451_v18 = vand.u32 4294901760, %v450_v14  ;;  %v459_v20 = vand.u32 4294901760, %v2711_v11 }
 0x103   : > { %v2719_v21 = vsub.f32 %v284_v16, %v2715_v17  ;;  %1986 = vmatprep.mubr.f32.mxu1 %v451_v18  ;;  %2065 = vmatmul.mubr.f32.gmra.mrb[8].mxu0 %v459_v20  ;;  %v247_v23 = vpop.trf.xlu0  ;;  %v460_v24 = vsub.f32 %v2711_v11, %v459_v20 }
 0x104   : > { %v287_v25 = vsel %vm252_vm0, %v247_v23, 0 }
 0x105   : > { %v2723_v27 = vand.u32 4294901760, %v287_v25  ;;  %v461_v28 = vand.u32 4294901760, %v460_v24  ;;  %v469_v30 = vand.u32 4294901760, %v2719_v21 }
 0x107   : > { %v2727_v31 = vsub.f32 %v287_v25, %v2723_v27  ;;  %1987 = vmatmul.mubr.f32.gmra.mrb[8].mxu1 %v461_v28  ;;  %2067 = vmatprep.mubr.f32.mxu0 %v469_v30  ;;  %v248_v32 = vpop.trf.xlu0  ;;  %v470_v34 = vsub.f32 %v2719_v21, %v469_v30 }
 0x108   : > { %v290_v35 = vsel %vm252_vm0, %v248_v32, 0 }
 0x109   : > { %v2731_v37 = vand.u32 4294901760, %v290_v35  ;;  %v471_v38 = vand.u32 4294901760, %v470_v34  ;;  %v479_v39 = vand.u32 4294901760, %v2727_v31 }
 0x10b   : > { %v2735_v41 = vsub.f32 %v290_v35, %v2731_v37  ;;  %1989 = vmatprep.mubr.f32.mxu1 %v471_v38  ;;  %2068 = vmatmul.mubr.f32.gmra.mrb[10].mxu0 %v479_v39  ;;  %v249_v42 = vpop.trf.xlu0  ;;  %v480_v44 = vsub.f32 %v2727_v31, %v479_v39 }
 0x10c   : > { %v293_v45 = vsel %vm252_vm0, %v249_v42, 0 }
 0x10d   : > { %v2739_v46 = vand.u32 4294901760, %v293_v45  ;;  %v481_v48 = vand.u32 4294901760, %v480_v44  ;;  %v489_v49 = vand.u32 4294901760, %v2735_v41 }
 0x10f   : > { %v2743_v51 = vsub.f32 %v293_v45, %v2739_v46  ;;  %1990 = vmatmul.mubr.f32.gmra.mrb[10].mxu1 %v481_v48  ;;  %2070 = vmatprep.mubr.f32.mxu0 %v489_v49  ;;  %v250_v52 = vpop.trf.xlu0  ;;  %v490_v53 = vsub.f32 %v2735_v41, %v489_v49 }
 0x110   : > { %v296_v55 = vsel %vm252_vm0, %v250_v52, 0 }
 0x111   : > { %v2747_v56 = vand.u32 4294901760, %v296_v55  ;;  %v491_v58 = vand.u32 4294901760, %v490_v53  ;;  %v499_v59 = vand.u32 4294901760, %v2743_v51 }
 0x113   : > { %v2751_v60 = vsub.f32 %v296_v55, %v2747_v56  ;;  %1992 = vmatprep.mubr.f32.mxu1 %v491_v58  ;;  %2071 = vmatmul.mubr.f32.gmra.mrb[12].mxu0 %v499_v59  ;;  %v251_v62 = vpop.trf.xlu0  ;;  %v500_v63 = vsub.f32 %v2743_v51, %v499_v59 }
 0x114   : > { %v299_v1 = vsel %vm252_vm0, %v251_v62, 0 }
 0x115   : > { %v2755_v4 = vand.u32 4294901760, %v299_v1  ;;  %v501_v5 = vand.u32 4294901760, %v500_v63  ;;  %v509_v7 = vand.u32 4294901760, %v2751_v60 }
 0x117   : > { %v2759_v8 = vsub.f32 %v299_v1, %v2755_v4  ;;  %1993 = vmatmul.mubr.f32.gmra.mrb[12].mxu1 %v501_v5  ;;  %2073 = vmatprep.mubr.f32.mxu0 %v509_v7  ;;  %v510_v12 = vsub.f32 %v2751_v60, %v509_v7 }
 0x119   : > { %v511_v14 = vand.u32 4294901760, %v510_v12  ;;  %v519_v16 = vand.u32 4294901760, %v2759_v8 }
 0x11b   : > { %1995 = vmatprep.mubr.f32.mxu1 %v511_v14  ;;  %2074 = vmatmul.mubr.f32.gmra.mrb[14].mxu0 %v519_v16  ;;  %v520_v18 = vsub.f32 %v2759_v8, %v519_v16 }
 0x11c   : > { %2078 = vmatprep.mubr.f32.mxu0 %v2635_v9 }
 0x11d   : > { %v521_v20 = vand.u32 4294901760, %v520_v18 }
 0x11f   : > { %1996 = vmatmul.mubr.f32.gmra.mrb[14].mxu1 %v521_v20  ;;  %2079 = vmatmul.mubr.f32.vlgmr.msra.gmra.mrb[0].mxu0 %v2641_v13 }
 0x120   : > { %2000 = vmatprep.mubr.f32.mxu1 %v2635_v9  ;;  %2081 = vmatprep.mubr.f32.mxu0 %v2649_v19 }
 0x121   : > { %2103 = vmatpush3.msra.mxu0 %v2623_v2 }
 0x123   : > { %2001 = vmatmul.mubr.f32.vlgmr.msra.gmra.mrb[0].mxu1 %v2641_v13  ;;  %2082 = vmatmul.mubr.f32.gmra.mrb[2].mxu0 %v2657_v26 }
 0x124   : > { %2025 = vmatpush3.msra.mxu1 %v2630_v3  ;;  %2003 = vmatprep.mubr.f32.mxu1 %v2649_v19 }
 0x125   : > { %2084 = vmatprep.mubr.f32.mxu0 %v2666_v33 }
 0x127   : > { %2004 = vmatmul.mubr.f32.gmra.mrb[2].mxu1 %v2657_v26  ;;  %2085 = vmatmul.mubr.f32.gmra.mrb[4].mxu0 %v2675_v40 }
 0x128   : > { %2006 = vmatprep.mubr.f32.mxu1 %v2666_v33  ;;  %2087 = vmatprep.mubr.f32.mxu0 %v2683_v47 }
 0x12b   : > { %2007 = vmatmul.mubr.f32.gmra.mrb[4].mxu1 %v2675_v40  ;;  %2088 = vmatmul.mubr.f32.gmra.mrb[6].mxu0 %v2691_v54 }
 0x12c   : > { %2009 = vmatprep.mubr.f32.mxu1 %v2683_v47  ;;  %2090 = vmatprep.mubr.f32.mxu0 %v2699_v61 }
 0x12f   : > { %2010 = vmatmul.mubr.f32.gmra.mrb[6].mxu1 %v2691_v54  ;;  %2091 = vmatmul.mubr.f32.gmra.mrb[8].mxu0 %v2707_v6 }
 0x130   : > { %2012 = vmatprep.mubr.f32.mxu1 %v2699_v61  ;;  %2093 = vmatprep.mubr.f32.mxu0 %v2715_v17 }
 0x133   : > { %2013 = vmatmul.mubr.f32.gmra.mrb[8].mxu1 %v2707_v6  ;;  %2094 = vmatmul.mubr.f32.gmra.mrb[10].mxu0 %v2723_v27 }
 0x134   : > { %2015 = vmatprep.mubr.f32.mxu1 %v2715_v17  ;;  %2096 = vmatprep.mubr.f32.mxu0 %v2731_v37 }
 0x137   : > { %2016 = vmatmul.mubr.f32.gmra.mrb[10].mxu1 %v2723_v27  ;;  %2097 = vmatmul.mubr.f32.gmra.mrb[12].mxu0 %v2739_v46 }
 0x138   : > { %2018 = vmatprep.mubr.f32.mxu1 %v2731_v37  ;;  %2099 = vmatprep.mubr.f32.mxu0 %v2747_v56 }
 0x13b   : > { %2019 = vmatmul.mubr.f32.gmra.mrb[12].mxu1 %v2739_v46  ;;  %2100 = vmatmul.mubr.f32.gmra.mrb[14].mxu0 %v2755_v4 }
 0x13c   : > { %2021 = vmatprep.mubr.f32.mxu1 %v2747_v56  ;;  %2104 = vmatprep.mubr.f32.mxu0 %v2635_v9 }
 0x13f   : > { %2022 = vmatmul.mubr.f32.gmra.mrb[14].mxu1 %v2755_v4  ;;  %2105 = vmatmul.mubr.f32.vlgmr.msra.gmra.mrb[0].mxu0 %v2641_v13 }
 0x140   : > { %2026 = vmatprep.mubr.f32.mxu1 %v2638_v10  ;;  %2107 = vmatprep.mubr.f32.mxu0 %v2649_v19 }
 0x143   : > { %2027 = vmatmul.mubr.f32.vlgmr.msra.gmra.mrb[0].mxu1 %v2645_v15  ;;  %2108 = vmatmul.mubr.f32.gmra.mrb[2].mxu0 %v2657_v26 }
 0x144   : > { %2029 = vmatprep.mubr.f32.mxu1 %v2653_v22  ;;  %2110 = vmatprep.mubr.f32.mxu0 %v2666_v33 }
 0x147   : > { %2030 = vmatmul.mubr.f32.gmra.mrb[2].mxu1 %v2662_v29  ;;  %2111 = vmatmul.mubr.f32.gmra.mrb[4].mxu0 %v2675_v40 }
 0x148   : > { %2032 = vmatprep.mubr.f32.mxu1 %v2671_v36  ;;  %2113 = vmatprep.mubr.f32.mxu0 %v2683_v47 }
 0x14b   : > { %2033 = vmatmul.mubr.f32.gmra.mrb[4].mxu1 %v2679_v43  ;;  %2114 = vmatmul.mubr.f32.gmra.mrb[6].mxu0 %v2691_v54 }
 0x14c   : > { %2035 = vmatprep.mubr.f32.mxu1 %v2687_v50  ;;  %2116 = vmatprep.mubr.f32.mxu0 %v2699_v61 }
 0x14f   : > { %2036 = vmatmul.mubr.f32.gmra.mrb[6].mxu1 %v2695_v57  ;;  %2117 = vmatmul.mubr.f32.gmra.mrb[8].mxu0 %v2707_v6 }
 0x150   : > { %2038 = vmatprep.mubr.f32.mxu1 %v2703_v0  ;;  %2119 = vmatprep.mubr.f32.mxu0 %v2715_v17 }
 0x153   : > { %2039 = vmatmul.mubr.f32.gmra.mrb[8].mxu1 %v2711_v11  ;;  %2120 = vmatmul.mubr.f32.gmra.mrb[10].mxu0 %v2723_v27 }
 0x154   : > { %2041 = vmatprep.mubr.f32.mxu1 %v2719_v21  ;;  %2122 = vmatprep.mubr.f32.mxu0 %v2731_v37 }
 0x157   : > { %2042 = vmatmul.mubr.f32.gmra.mrb[10].mxu1 %v2727_v31  ;;  %2123 = vmatmul.mubr.f32.gmra.mrb[12].mxu0 %v2739_v46 }
 0x158   : > { %2044 = vmatprep.mubr.f32.mxu1 %v2735_v41  ;;  %2125 = vmatprep.mubr.f32.mxu0 %v2747_v56 }
 0x15b   : > { %2045 = vmatmul.mubr.f32.gmra.mrb[12].mxu1 %v2743_v51  ;;  %2126 = vmatmul.mubr.f32.gmra.mrb[14].mxu0 %v2755_v4 }
 0x15c   : > { %2047 = vmatprep.mubr.f32.mxu1 %v2751_v60 }
 0x15f   : > { %2048 = vmatmul.mubr.f32.gmra.mrb[14].mxu1 %v2759_v8 }
 0x212   : > { %v2106_v2 = vpop.f32.mrb[0].mxu0 }
 0x213   : > { %v1298_v3 = vpop.f32.mrb[1].mxu0 }
 0x216   : > { %v2028_v9 = vpop.f32.mrb[0].mxu1  ;;  %v2109_v10 = vpop.f32.mrb[2].mxu0 }
 0x217   : > { %v2128_v13 = vadd.f32 %v2106_v2, %v2028_v9  ;;  %v763_v15 = vpop.f32.mrb[1].mxu1  ;;  %v1310_v19 = vpop.f32.mrb[3].mxu0 }
 0x218   : > { %v2129_v22 = vadd.f32 %v1298_v3, %v763_v15 }
 0x219   : > { %v1393_v26 = vmin.f32 %v2128_v13, 1e+30 }
 0x21a   : > { %v1408_v29 = vmin.f32 %v2129_v22, %v2128_v13  ;;  %v2031_v33 = vpop.f32.mrb[2].mxu1  ;;  %v2112_v36 = vpop.f32.mrb[4].mxu0  ;;  %v1392_v40 = vmin.f32 %v2129_v22, 1e+30 }
 0x21b   : > { %v2130_v43 = vadd.f32 %v2109_v10, %v2031_v33  ;;  %v1322_v47 = vpop.f32.mrb[5].mxu0  ;;  %1428 = vmin.xlane.f32.xlu1 %v1393_v26  ;;  %v777_v50 = vpop.f32.mrb[3].mxu1 }
 0x21c   : > { %v2131_v54 = vadd.f32 %v1310_v19, %v777_v50  ;;  %1426 = vmin.xlane.f32.xlu0 %v1392_v40 }
 0x21e   : > { %v1409_v57 = vmin.f32 %v2131_v54, %v2130_v43  ;;  %v2034_v61 = vpop.f32.mrb[4].mxu1  ;;  %v2115_v0 = vpop.f32.mrb[6].mxu0 }
 0x21f   : > { %v2132_v6 = vadd.f32 %v2112_v36, %v2034_v61  ;;  %v791_v11 = vpop.f32.mrb[5].mxu1  ;;  %v1334_v17 = vpop.f32.mrb[7].mxu0 }
 0x220   : > { %v1416_v21 = vmin.f32 %v1408_v29, %v1409_v57  ;;  %v2133_v23 = vadd.f32 %v1322_v47, %v791_v11  ;;  %v1709_v47 = vlaneseq }
 0x222   : > { %v1410_v24 = vmin.f32 %v2133_v23, %v2132_v6  ;;  %v2037_v25 = vpop.f32.mrb[6].mxu1  ;;  %v2118_v27 = vpop.f32.mrb[8].mxu0 }
 0x223   : > { %v2134_v28 = vadd.f32 %v2115_v0, %v2037_v25  ;;  %v805_v30 = vpop.f32.mrb[7].mxu1  ;;  %v1346_v31 = vpop.f32.mrb[9].mxu0  ;;  %v1710_v0 = vand.u32 127, %v1709_v47 }
 0x224   : > { %v2135_v32 = vadd.f32 %v1334_v17, %v805_v30 }
 0x225   : > { %vm1711_vm8 = vcmp.lt.s32.totalorder %v1710_v0, 16 }
 0x226   : > { %v1411_v34 = vmin.f32 %v2135_v32, %v2134_v28  ;;  %v2040_v35 = vpop.f32.mrb[8].mxu1  ;;  %v2121_v37 = vpop.f32.mrb[10].mxu0 }
 0x227   : > { %v2136_v38 = vadd.f32 %v2118_v27, %v2040_v35  ;;  %v819_v39 = vpop.f32.mrb[9].mxu1  ;;  %v1358_v41 = vpop.f32.mrb[11].mxu0 }
 0x228   : > { %v1417_v42 = vmin.f32 %v1410_v24, %v1411_v34  ;;  %v2137_v44 = vadd.f32 %v1346_v31, %v819_v39 }
 0x22a   : > { %v1420_v45 = vmin.f32 %v1416_v21, %v1417_v42  ;;  %v1412_v46 = vmin.f32 %v2137_v44, %v2136_v38  ;;  %v2043_v48 = vpop.f32.mrb[10].mxu1  ;;  %v2124_v49 = vpop.f32.mrb[12].mxu0 }
 0x22b   : > { %v2138_v51 = vadd.f32 %v2121_v37, %v2043_v48  ;;  %v833_v52 = vpop.f32.mrb[11].mxu1  ;;  %v1370_v53 = vpop.f32.mrb[13].mxu0 }
 0x22c   : > { %v2139_v55 = vadd.f32 %v1358_v41, %v833_v52 }
 0x22e   : > { %v1413_v56 = vmin.f32 %v2139_v55, %v2138_v51  ;;  %v2046_v58 = vpop.f32.mrb[12].mxu1  ;;  %v2127_v59 = vpop.f32.mrb[14].mxu0 }
 0x22f   : > { %v2140_v60 = vadd.f32 %v2124_v49, %v2046_v58  ;;  %v847_v62 = vpop.f32.mrb[13].mxu1  ;;  %v1382_v63 = vpop.f32.mrb[15].mxu0 }
 0x230   : > { %v1418_v1 = vmin.f32 %v1412_v46, %v1413_v56  ;;  %v2141_v4 = vadd.f32 %v1370_v53, %v847_v62 }
 0x232   : > { %v1414_v5 = vmin.f32 %v2141_v4, %v2140_v60  ;;  %v2049_v7 = vpop.f32.mrb[14].mxu1 }
 0x233   : > { %v2142_v8 = vadd.f32 %v2127_v59, %v2049_v7  ;;  %v861_v12 = vpop.f32.mrb[15].mxu1 }
 0x234   : > { %v2143_v14 = vadd.f32 %v1382_v63, %v861_v12 }
 0x236   : > { %v1415_v16 = vmin.f32 %v2143_v14, %v2142_v8 }
 0x238   : > { %v1419_v18 = vmin.f32 %v1414_v5, %v1415_v16 }
 0x23a   : > { %v1421_v20 = vmin.f32 %v1418_v1, %v1419_v18 }
 0x23c   : > { %v1422_v2 = vmin.f32 %v1420_v45, %v1421_v20 }
 0x23e   : > { %v1424_v3 = vmin.f32 %v1422_v2, 1e+30 }
 0x240   : > { %v1702_v9 = vrot.slane %v1424_v3, 4 }
 0x242   : > { %v1703_v10 = vmin.f32 %v1424_v3, %v1702_v9 }
 0x244   : > { %v1704_v13 = vrot.slane %v1703_v10, 2 }
 0x246   : > { %v1705_v15 = vmin.f32 %v1703_v10, %v1704_v13 }
 0x248   : > { %v1706_v19 = vrot.slane %v1705_v15, 1 }
 0x24a   : > { %v1707_v22 = vmin.f32 %v1705_v15, %v1706_v19 }
 0x24c   : > { %v1708_v26 = vmax.f32 %v1707_v22, 0.0 }
 0x24e   : > { %2280 = vrsqrt.f32 %v1708_v26  ;;  %vm1714_vm2 = vcmp.eq.f32.partialorder %v1708_v26, inf  ;;  %v1717_v27 = vand.u32 2147483648, %v1708_v26  ;;  %vm1716_vm7 = vcmp.eq.f32.partialorder %v1708_v26, 0.0 }
 0x258   : > { %v2281_v43 = vpop.eup %2280 }
 0x259   : > { %v1713_v50 = vmul.f32 %v2281_v43, %v1708_v26 }
 0x25b   : > { %v1715_v17 = vsel %vm1714_vm2, %v1708_v26, %v1713_v50 }
 0x25c   : > { %v1718_v32 = vsel %vm1716_vm7, %v1717_v27, %v1715_v17 }
 0x25d   : > { %v1719_v35 = vsel %vm1711_vm8, %v1718_v32, 0.0 }
 0x25e   : > { %v1721_v37 = vsel %vm1720_vm9, %v1719_v35, 0.0 }
 0x2a8   : > { %v1429_v29 = vpop.xlane.xlu1 %1428 }
 0x2a9   : > { %v1459_v33 = vmax.f32 %v1429_v29, 0.0  ;;  %v1427_v36 = vpop.xlane.xlu0 %1426 }
 0x2aa   : > { %v1458_v40 = vmax.f32 %v1427_v36, 0.0 }
 0x2ab   : > { %2282 = vrsqrt.f32 %v1459_v33  ;;  %vm1534_vm3 = vcmp.eq.f32.partialorder %v1459_v33, inf  ;;  %v1537_v11 = vand.u32 2147483648, %v1459_v33  ;;  %vm1536_vm5 = vcmp.eq.f32.partialorder %v1459_v33, 0.0 }
 0x2ac   : > { %2284 = vrsqrt.f32 %v1458_v40  ;;  %vm1527_vm4 = vcmp.eq.f32.partialorder %v1458_v40, inf  ;;  %v1530_v21 = vand.u32 2147483648, %v1458_v40  ;;  %vm1529_vm6 = vcmp.eq.f32.partialorder %v1458_v40, 0.0 }
 0x2b5   : > { %v2283_v54 = vpop.eup %2282 }
 0x2b6   : > { %v2285_v57 = vpop.eup %2284  ;;  %v1533_v61 = vmul.f32 %v2283_v54, %v1459_v33 }
 0x2b7   : > { %v1526_v6 = vmul.f32 %v2285_v57, %v1458_v40 }
 0x2b8   : > { %v1535_v23 = vsel %vm1534_vm3, %v1459_v33, %v1533_v61 }
 0x2b9   : > { %v1528_v24 = vsel %vm1527_vm4, %v1458_v40, %v1526_v6  ;;  %v1538_v25 = vsel %vm1536_vm5, %v1537_v11, %v1535_v23 }
 0x2ba   : > { %v1531_v28 = vsel %vm1529_vm6, %v1530_v21, %v1528_v24  ;;  %v1656_v30 = vsel %vm1654_vm1, %v1538_v25, 0.0 }
 0x2bb   : > { %v1655_v31 = vsel %vm1654_vm1, %v1531_v28, 0.0 }
 0x2bc   : > { %v1657_v34 = vadd.f32 %v1656_v30, %v1655_v31 }
 0x2be   : > { %1686 = vadd.xlane.f32.xlu1 %v1657_v34 }
 0x2c2   : > { %1722 = vadd.xlane.f32.xlu1 %v1721_v37 }
 0x34b   : > { %v1687_v38 = vpop.xlane.xlu1 %1686 }
 0x34c   : > { %v1688_v39 = vrot.slane %v1687_v38, 4 }
 0x34e   : > { %v1689_v41 = vadd.f32 %v1688_v39, %v1687_v38 }
 0x34f   : > { %v1723_v42 = vpop.xlane.xlu1 %1722 }
 0x350   : > { %v1690_v44 = vrot.slane %v1689_v41, 2  ;;  %v1724_v45 = vrot.slane %v1723_v42, 4 }
 0x352   : > { %v1725_v46 = vadd.f32 %v1724_v45, %v1723_v42  ;;  %v1691_v48 = vadd.f32 %v1690_v44, %v1689_v41 }
 0x354   : > { %v1726_v49 = vrot.slane %v1725_v46, 2  ;;  %v1692_v51 = vrot.slane %v1691_v48, 1 }
 0x356   : > { %v1727_v52 = vadd.f32 %v1726_v49, %v1725_v46  ;;  %v1693_v53 = vadd.f32 %v1692_v51, %v1691_v48 }
 0x358   : > { %2208 = vpush %v1693_v53  ;;  %v1728_v55 = vrot.slane %v1727_v52, 1 }
 0x35a   : > { %v1729_v56 = vadd.f32 %v1728_v55, %v1727_v52 }
 0x35c   : > { %2210 = vpush %v1729_v56 }
 0x389   : > { %s2209_s21 = spop %2208 }
 0x38a   : > { %s1733_s16 = smul.f32 0.0625, %s2209_s21 }
 0x38d   : > { %s2211_s19 = spop %2210 }
 0x38e   : > { %s1731_s30 = smul.f32 0.0625, %s2211_s19 }
 0x390   : > { %s1734_s27 = sadd.f32 %s1733_s16, %s1731_s30 }
 0x392   : > { %s1735_s25 = smul.f32 0.5, %s1734_s27 }
 0x394   : > { %v1736_v58 = vstv %s1735_s25 }
 0x395   : > { %1737 = vst [vmem:[%s210_s28] sm:$0xff] %v1736_v58 }
 0x396   : > { %2359 = shalt.err (!%p2356_p2)
}
 0x397   : > { %s2360_s15 = scalar_lea.hbm %s2837_s8, 128  ;;  %s2364_s16 = scalar_lea.hbm %s2888_s2, 256 }
 0x398   : > { %p2361_p9 = scmp.ne.s32.totalorder %s2837_s8, %s2360_s15  ;;  %p2365_p6 = scmp.lt.u32.totalorder %s2837_s8, %s2888_s2 }
 0x399   : > { %p2366_p13 = scmp.lt.u32.totalorder %s2364_s16, %s2360_s15  ;;  %p2368_p0 = scmp.lt.u32.totalorder %s2360_s15, %s2837_s8 }
 0x39a   : > { %p2362_p11 = pnand %p2361_p9, %p2901_p5 }
 0x39b   : > { %p2367_p8 = por %p2366_p13, %p2365_p6 }
 0x39c   : > { %p2363_p3 = pneg %p2362_p11 }
 0x39d   : > { %p2369_p7 = por %p2368_p0, %p2367_p8 }
 0x39f   : > { %p2370_p4 = pnand %p2369_p7, %p2363_p3 }
 0x3a1   : > { %2373 = shalt.err (!%p2370_p4)
}
 0x3a2   : > { %2216 = dma.vmem_to_hbm [thread:$0]  (%p2901_p5), %s2839_s29, 128, %s2837_s8, %s1739_s4  }
 0x3a3 PF: > { %s1764_s20 = sand.u32 1, %s2412_s9   ;;  %p2902_p10 = scmp.ne.s32.totalorder %s2894_s24, 0 }
 0x3a4   : > { %p2903_p12 = scmp.ge.s32.totalorder %s2432_s14, 2  ;;  %s1765_s27 = scalar_lea.sflag [#allocation6], %s1764_s20 }
 0x3a6   : > { %p2226_p1 = pnand %p2903_p12, %p2902_p10 }
 0x3a8   : > { %2407 = dma.done.wait (!%p2226_p1), %s1765_s27, 128  }
 0x3a9   : > { %2409 = vsyncadd (!%p2226_p1), %s1765_s27, 4294967168  ;;  %s21_s14 = sadd.s32 1, %s2432_s14   ;;  %s2904_s9 = smov %s2416_s10 }
 0x3aa   : > { %p18_p2 = scmp.ge.s32.totalorder %s21_s14, 4   ;;  %s2905_s10 = smov %s2420_s11 }
 0x3ab   : > { %s2906_s11 = smov %s2508_s23  ;;  %s2907_s12 = smov %s2428_s13 }
 0x3ac   : > { %s2908_s13 = smov %s2910_s17  ;;  %20 = sbr.rel (!%p18_p2) target bundleno = 8 (0x8), region = 96 }
 0x3b3   :  { %1770 = vsyncpa [#allocation5], 1 }
 0x3b4   :  { %1772 = vsyncpa [#allocation5 + $0x1], 1 }
 0x3b5   :  { %1773 = vsyncpa [#allocation8], 1 }
 0x3b6   :  { %1775 = vsyncpa [#allocation8 + $0x1], 1 }
 0x3b7   :  { %1776 = vsyncpa [#allocation6], 1 }
 0x3b8   :  { %1778 = vsyncpa [#allocation6 + $0x1], 1 }

</bundles_post_ra>
